<compile_context>
chip_gen: v7x
topology: tpu7x:2x2x1
jax: 0.10.0
libtpu: 0.0.40
codegen_flags: <defaults>
</compile_context>

<pallas_src>
import functools

import jax
import jax.numpy as jnp
from jax.experimental import pallas as pl
from jax.experimental.pallas import tpu as pltpu


def _decoder_kernel(coords_ref, w1c_ref, c_ref, w2_ref, b2_ref, w3_ref, b3_ref,
                    w4_ref, b4_ref, out_ref):
    # Feature-major layout: rows = features (sublanes), cols = grid points
    # (lanes).  TM is a multiple of 128 -> every tile is lane-dense.
    coords = coords_ref[...]                       # (2, TM): row0 = i, row1 = j
    ii = coords[0:1, :]                            # (1, TM)
    jj = coords[1:2, :]                            # (1, TM)

    # ---- layer 1 (K = 2) on the VPU: two broadcast FMAs ----------------------
    # h1[f, t] = W1c[f, 0] * i[t] + W1c[f, 1] * j[t] + c[f]
    w1c = w1c_ref[...]                             # (128, 2)
    h1 = w1c[:, 0:1] * ii + w1c[:, 1:2] * jj + c_ref[...]        # (128, TM)
    h1 = jnp.maximum(h1, 0.0)

    # ---- layers 2-4 on the MXU (f32 accumulation) -----------------------------
    h2 = jnp.dot(w2_ref[...], h1, preferred_element_type=jnp.float32) + b2_ref[...]
    h2 = jnp.maximum(h2, 0.0)                      # (64, TM)

    h3 = jnp.dot(w3_ref[...], h2, preferred_element_type=jnp.float32) + b3_ref[...]
    h3 = jnp.maximum(h3, 0.0)                      # (32, TM)

    h4 = jnp.dot(w4_ref[...], h3, preferred_element_type=jnp.float32) + b4_ref[...]
    # h4: (2, TM); row 0 = mu, row 1 = log_sigma

    # softplus(x) = logaddexp(x, 0) (numerically stable); keep row 0 as-is.
    sp = 0.1 + 0.9 * jnp.logaddexp(h4, 0.0)        # (2, TM)
    row = jax.lax.broadcasted_iota(jnp.int32, h4.shape, 0)
    out_ref[...] = jnp.where(row == 0, h4, sp)     # single lane-dense store


def _round_up(x, m):
    return ((x + m - 1) // m) * m


def _choose_tile(n_rows):
    """Row tile (lane width). Large tile, but keep >= 2 grid steps when
    possible so the 'parallel' axis can use both v7x TensorCores."""
    lane = 128
    n128 = _round_up(n_rows, lane)
    if n128 <= lane:
        return n128
    return max(lane, min(1024, _round_up(n128 // 2, lane)))


@functools.partial(jax.jit, static_argnames=("m", "n"))
def decoder_forward(r, params, m, n):
    """r: array with 128 elements (the aggregated representation).
    Weights stored as (in, out): fc(x) = x @ W + b."""
    w1, b1, w2, b2, w3, b3, w4, b4 = params
    N = m * n
    hp = jax.lax.Precision.HIGHEST

    # --- fold the broadcast representation r into the layer-1 bias ------------
    # fc1(concat([coords, r])) = coords @ W1[:2] + (r @ W1[2:] + b1)
    r_row = jnp.reshape(r, (1, 128))
    c = jnp.dot(r_row, w1[2:, :], precision=hp) + b1              # (1, 128)

    # transposed (feature-major) copies of the small weights / biases
    w1cT = jnp.transpose(w1[:2, :])                               # (128, 2)
    cT = jnp.transpose(c)                                         # (128, 1)
    w2T, b2T = jnp.transpose(w2), jnp.transpose(b2)               # (64,128),(64,1)
    w3T, b3T = jnp.transpose(w3), jnp.transpose(b3)               # (32,64),(32,1)
    w4T, b4T = jnp.transpose(w4), jnp.transpose(b4)               # (2,32),(2,1)

    # --- coordinate grid, feature-major, padded to the row tile ---------------
    TM = _choose_tile(N)
    N_pad = _round_up(N, TM)
    ii = jnp.repeat(jnp.arange(m, dtype=jnp.float32), n)
    jj = jnp.tile(jnp.arange(n, dtype=jnp.float32), m)
    coordsT = jnp.stack([ii, jj], axis=0)                         # (2, N)
    if N_pad != N:
        coordsT = jnp.pad(coordsT, ((0, 0), (0, N_pad - N)))

    grid = (N_pad // TM,)
    const = lambda i: (0, 0)  # whole weight / bias resident at every grid step

    out = pl.pallas_call(
        _decoder_kernel,
        out_shape=jax.ShapeDtypeStruct((2, N_pad), jnp.float32),
        grid_spec=pltpu.PrefetchScalarGridSpec(
            num_scalar_prefetch=0,
            grid=grid,
            in_specs=[
                pl.BlockSpec((2, TM), lambda i: (0, i)),   # coords tile (8 B/row)
                pl.BlockSpec((128, 2), const),             # W1 coord cols, transposed
                pl.BlockSpec((128, 1), const),             # folded bias (r@W1_r + b1)^T
                pl.BlockSpec((64, 128), const),            # W2^T
                pl.BlockSpec((64, 1), const),              # b2^T
                pl.BlockSpec((32, 64), const),             # W3^T
                pl.BlockSpec((32, 1), const),              # b3^T
                pl.BlockSpec((2, 32), const),              # W4^T
                pl.BlockSpec((2, 1), const),               # b4^T
            ],
            out_specs=pl.BlockSpec((2, TM), lambda i: (0, i)),
        ),
        compiler_params=pltpu.CompilerParams(
            dimension_semantics=("parallel",)),
    )(coordsT, w1cT, cT, w2T, b2T, w3T, b3T, w4T, b4T)

    mu = out[0, :N]
    sigma = out[1, :N]
    return mu, sigma


def init_params(key):
    """Deterministic init mimicking nn.Linear defaults (U[-1/sqrt(fan_in), +]).
    Weights stored as (in, out) so the layers compute x @ W + b."""
    dims = [(130, 128), (128, 64), (64, 32), (32, 2)]
    params = []
    for (fan_in, fan_out) in dims:
        key, kw, kb = jax.random.split(key, 3)
        bound = 1.0 / jnp.sqrt(fan_in)
        w = jax.random.uniform(kw, (fan_in, fan_out), jnp.float32, -bound, bound)
        b = jax.random.uniform(kb, (1, fan_out), jnp.float32, -bound, bound)
        params += [w, b]
    return tuple(params)


def _reference(r, params, m, n):
    """Plain-JAX reference for correctness checking (mirrors the PyTorch code)."""
    w1, b1, w2, b2, w3, b3, w4, b4 = params
    N = m * n
    hp = jax.lax.Precision.HIGHEST
    ii = jnp.repeat(jnp.arange(m, dtype=jnp.float32), n)
    jj = jnp.tile(jnp.arange(n, dtype=jnp.float32), m)
    coords = jnp.stack([ii, jj], axis=1)
    r_rows = jnp.broadcast_to(jnp.reshape(r, (1, 128)), (N, 128))
    out = jnp.concatenate([coords, r_rows], axis=1)
    h = jnp.maximum(jnp.dot(out, w1, precision=hp) + b1, 0.0)
    h = jnp.maximum(jnp.dot(h, w2, precision=hp) + b2, 0.0)
    h = jnp.maximum(jnp.dot(h, w3, precision=hp) + b3, 0.0)
    h = jnp.dot(h, w4, precision=hp) + b4
    mu = h[:, 0]
    sigma = 0.1 + 0.9 * jax.nn.softplus(h[:, 1])
    return mu, sigma


if __name__ == "__main__":
    key = jax.random.PRNGKey(0)
    key_r, key_p = jax.random.split(key)

    r = jax.random.normal(key_r, (1, 128), jnp.float32)   # aggregated representation
    params = init_params(key_p)

    # Two cases: N=128 (single tile) and N=400 (padding + 2-step grid).
    for (m, n) in [(16, 8), (20, 20)]:
        mu, sigma = decoder_forward(r, params, m, n)
        jax.block_until_ready((mu, sigma))

        mu_ref, sigma_ref = _reference(r, params, m, n)
        assert mu.shape == (m * n,) and sigma.shape == (m * n,)
        assert jnp.allclose(mu, mu_ref, atol=1e-4, rtol=1e-4)
        assert jnp.allclose(sigma, sigma_ref, atol=1e-4, rtol=1e-4)

    print("KERNEL_OK")
</pallas_src>

<mosaic_0001>
module attributes {stable_mosaic.version = 11 : i64} {
  func.func @_decoder_kernel(%arg0: i32, %arg1: memref<2x128xf32, #tpu.memory_space<vmem>>, %arg2: memref<128x2xf32, #tpu.memory_space<vmem>>, %arg3: memref<128x1xf32, #tpu.memory_space<vmem>>, %arg4: memref<64x128xf32, #tpu.memory_space<vmem>>, %arg5: memref<64x1xf32, #tpu.memory_space<vmem>>, %arg6: memref<32x64xf32, #tpu.memory_space<vmem>>, %arg7: memref<32x1xf32, #tpu.memory_space<vmem>>, %arg8: memref<2x32xf32, #tpu.memory_space<vmem>>, %arg9: memref<2x1xf32, #tpu.memory_space<vmem>>, %arg10: memref<2x128xf32, #tpu.memory_space<vmem>>) attributes {dimension_semantics = [#tpu.dimension_semantics<parallel>], iteration_bounds = array<i64: 1>, scalar_prefetch = 0 : i64, scratch_operands = 0 : i64, tpu.core_type = #tpu.core_type<tc>, window_params = [{transform_indices = @transform_0, window_bounds = array<i64: 2, 128>}, {pipeline_mode = #tpu.pipeline_mode<synchronous>, transform_indices = @transform_1, window_bounds = array<i64: 128, 2>}, {pipeline_mode = #tpu.pipeline_mode<synchronous>, transform_indices = @transform_2, window_bounds = array<i64: 128, 1>}, {pipeline_mode = #tpu.pipeline_mode<synchronous>, transform_indices = @transform_3, window_bounds = array<i64: 64, 128>}, {pipeline_mode = #tpu.pipeline_mode<synchronous>, transform_indices = @transform_4, window_bounds = array<i64: 64, 1>}, {pipeline_mode = #tpu.pipeline_mode<synchronous>, transform_indices = @transform_5, window_bounds = array<i64: 32, 64>}, {pipeline_mode = #tpu.pipeline_mode<synchronous>, transform_indices = @transform_6, window_bounds = array<i64: 32, 1>}, {pipeline_mode = #tpu.pipeline_mode<synchronous>, transform_indices = @transform_7, window_bounds = array<i64: 2, 32>}, {pipeline_mode = #tpu.pipeline_mode<synchronous>, transform_indices = @transform_8, window_bounds = array<i64: 2, 1>}, {transform_indices = @transform_9, window_bounds = array<i64: 2, 128>}]} {
    %c0 = arith.constant 0 : index
    %c0_0 = arith.constant 0 : index
    %0 = vector.load %arg1[%c0, %c0_0] : memref<2x128xf32, #tpu.memory_space<vmem>>, vector<2x128xf32>
    %1 = vector.extract_strided_slice %0 {offsets = [0, 0], sizes = [1, 128], strides = [1, 1]} : vector<2x128xf32> to vector<1x128xf32>
    %2 = vector.extract_strided_slice %0 {offsets = [1, 0], sizes = [1, 128], strides = [1, 1]} : vector<2x128xf32> to vector<1x128xf32>
    %c0_1 = arith.constant 0 : index
    %c0_2 = arith.constant 0 : index
    %3 = vector.load %arg2[%c0_1, %c0_2] : memref<128x2xf32, #tpu.memory_space<vmem>>, vector<128x2xf32>
    %4 = vector.extract_strided_slice %3 {offsets = [0, 0], sizes = [128, 1], strides = [1, 1]} : vector<128x2xf32> to vector<128x1xf32>
    %5 = vector.broadcast %4 : vector<128x1xf32> to vector<128x128xf32>
    %6 = vector.broadcast %1 : vector<1x128xf32> to vector<128x128xf32>
    %7 = arith.mulf %5, %6 : vector<128x128xf32>
    %8 = vector.extract_strided_slice %3 {offsets = [0, 1], sizes = [128, 1], strides = [1, 1]} : vector<128x2xf32> to vector<128x1xf32>
    %9 = vector.broadcast %8 : vector<128x1xf32> to vector<128x128xf32>
    %10 = vector.broadcast %2 : vector<1x128xf32> to vector<128x128xf32>
    %11 = arith.mulf %9, %10 : vector<128x128xf32>
    %12 = arith.addf %7, %11 : vector<128x128xf32>
    %c0_3 = arith.constant 0 : index
    %c0_4 = arith.constant 0 : index
    %13 = vector.load %arg3[%c0_3, %c0_4] : memref<128x1xf32, #tpu.memory_space<vmem>>, vector<128x1xf32>
    %14 = vector.broadcast %13 : vector<128x1xf32> to vector<128x128xf32>
    %15 = arith.addf %12, %14 : vector<128x128xf32>
    %cst = arith.constant 0.000000e+00 : f32
    %16 = vector.broadcast %cst : f32 to vector<128x128xf32>
    %17 = arith.maximumf %15, %16 : vector<128x128xf32>
    %c0_5 = arith.constant 0 : index
    %c0_6 = arith.constant 0 : index
    %18 = vector.load %arg4[%c0_5, %c0_6] : memref<64x128xf32, #tpu.memory_space<vmem>>, vector<64x128xf32>
    %cst_7 = arith.constant dense<0.000000e+00> : vector<64x128xf32>
    %19 = tpu.matmul %18, %17, %cst_7 {dimension_numbers = #tpu.dot_dimension_numbers<[1], [0], [0], [1], [0, 0, 1, 1], [], []>} : vector<64x128xf32>, vector<128x128xf32>, vector<64x128xf32> -> vector<64x128xf32>
    %c0_8 = arith.constant 0 : index
    %c0_9 = arith.constant 0 : index
    %20 = vector.load %arg5[%c0_8, %c0_9] : memref<64x1xf32, #tpu.memory_space<vmem>>, vector<64x1xf32>
    %21 = vector.broadcast %20 : vector<64x1xf32> to vector<64x128xf32>
    %22 = arith.addf %19, %21 : vector<64x128xf32>
    %cst_10 = arith.constant 0.000000e+00 : f32
    %23 = vector.broadcast %cst_10 : f32 to vector<64x128xf32>
    %24 = arith.maximumf %22, %23 : vector<64x128xf32>
    %c0_11 = arith.constant 0 : index
    %c0_12 = arith.constant 0 : index
    %25 = vector.load %arg6[%c0_11, %c0_12] : memref<32x64xf32, #tpu.memory_space<vmem>>, vector<32x64xf32>
    %cst_13 = arith.constant dense<0.000000e+00> : vector<32x128xf32>
    %26 = tpu.matmul %25, %24, %cst_13 {dimension_numbers = #tpu.dot_dimension_numbers<[1], [0], [0], [1], [0, 0, 1, 1], [], []>} : vector<32x64xf32>, vector<64x128xf32>, vector<32x128xf32> -> vector<32x128xf32>
    %c0_14 = arith.constant 0 : index
    %c0_15 = arith.constant 0 : index
    %27 = vector.load %arg7[%c0_14, %c0_15] : memref<32x1xf32, #tpu.memory_space<vmem>>, vector<32x1xf32>
    %28 = vector.broadcast %27 : vector<32x1xf32> to vector<32x128xf32>
    %29 = arith.addf %26, %28 : vector<32x128xf32>
    %cst_16 = arith.constant 0.000000e+00 : f32
    %30 = vector.broadcast %cst_16 : f32 to vector<32x128xf32>
    %31 = arith.maximumf %29, %30 : vector<32x128xf32>
    %c0_17 = arith.constant 0 : index
    %c0_18 = arith.constant 0 : index
    %32 = vector.load %arg8[%c0_17, %c0_18] : memref<2x32xf32, #tpu.memory_space<vmem>>, vector<2x32xf32>
    %cst_19 = arith.constant dense<0.000000e+00> : vector<2x128xf32>
    %33 = tpu.matmul %32, %31, %cst_19 {dimension_numbers = #tpu.dot_dimension_numbers<[1], [0], [0], [1], [0, 0, 1, 1], [], []>} : vector<2x32xf32>, vector<32x128xf32>, vector<2x128xf32> -> vector<2x128xf32>
    %c0_20 = arith.constant 0 : index
    %c0_21 = arith.constant 0 : index
    %34 = vector.load %arg9[%c0_20, %c0_21] : memref<2x1xf32, #tpu.memory_space<vmem>>, vector<2x1xf32>
    %35 = vector.broadcast %34 : vector<2x1xf32> to vector<2x128xf32>
    %36 = arith.addf %33, %35 : vector<2x128xf32>
    %cst_22 = arith.constant 0.000000e+00 : f32
    %37 = vector.broadcast %cst_22 : f32 to vector<2x128xf32>
    %38 = arith.maximumf %36, %37 : vector<2x128xf32>
    %39 = vector.broadcast %cst_22 : f32 to vector<2x128xf32>
    %40 = arith.subf %36, %39 : vector<2x128xf32>
    %41 = arith.cmpf one, %40, %40 : vector<2x128xf32>
    %42 = vector.broadcast %cst_22 : f32 to vector<2x128xf32>
    %43 = arith.addf %36, %42 : vector<2x128xf32>
    %44 = math.absf %40 : vector<2x128xf32>
    %cst_23 = arith.constant 0.000000e+00 : f32
    %45 = vector.broadcast %cst_23 : f32 to vector<2x128xf32>
    %46 = arith.subf %45, %44 : vector<2x128xf32>
    %47 = math.exp %46 : vector<2x128xf32>
    %48 = math.log1p %47 : vector<2x128xf32>
    %49 = arith.addf %38, %48 : vector<2x128xf32>
    %50 = arith.select %41, %43, %49 : vector<2x128xi1>, vector<2x128xf32>
    %cst_24 = arith.constant 0.899999976 : f32
    %51 = vector.broadcast %cst_24 : f32 to vector<2x128xf32>
    %52 = arith.mulf %51, %50 : vector<2x128xf32>
    %cst_25 = arith.constant 1.000000e-01 : f32
    %53 = vector.broadcast %cst_25 : f32 to vector<2x128xf32>
    %54 = arith.addf %53, %52 : vector<2x128xf32>
    %55 = tpu.iota {dimensions = array<i32: 0>} : vector<2x128xi32>
    %c0_i32 = arith.constant 0 : i32
    %56 = vector.broadcast %c0_i32 : i32 to vector<2x128xi32>
    %57 = arith.cmpi eq, %55, %56 : vector<2x128xi32>
    %58 = arith.select %57, %36, %54 : vector<2x128xi1>, vector<2x128xf32>
    %c0_26 = arith.constant 0 : index
    %c0_27 = arith.constant 0 : index
    %59 = vector.load %arg10[%c0_26, %c0_27] : memref<2x128xf32, #tpu.memory_space<vmem>>, vector<2x128xf32>
    tpu.vector_store %arg10[%c0_26, %c0_27], %58 {strides = array<i32>} : memref<2x128xf32, #tpu.memory_space<vmem>>, vector<2x128xf32>,
    return
  }
  func.func @transform_0(%arg0: i32) -> (i32, i32) {
    %c0_i32 = arith.constant 0 : i32
    %c0_i32_0 = arith.constant 0 : i32
    return %c0_i32, %arg0 : i32, i32
  }
  func.func @transform_1(%arg0: i32) -> (i32, i32) {
    %c0_i32 = arith.constant 0 : i32
    %c0_i32_0 = arith.constant 0 : i32
    %c0_i32_1 = arith.constant 0 : i32
    return %c0_i32, %c0_i32_0 : i32, i32
  }
  func.func @transform_2(%arg0: i32) -> (i32, i32) {
    %c0_i32 = arith.constant 0 : i32
    %c0_i32_0 = arith.constant 0 : i32
    %c0_i32_1 = arith.constant 0 : i32
    return %c0_i32, %c0_i32_0 : i32, i32
  }
  func.func @transform_3(%arg0: i32) -> (i32, i32) {
    %c0_i32 = arith.constant 0 : i32
    %c0_i32_0 = arith.constant 0 : i32
    %c0_i32_1 = arith.constant 0 : i32
    return %c0_i32, %c0_i32_0 : i32, i32
  }
  func.func @transform_4(%arg0: i32) -> (i32, i32) {
    %c0_i32 = arith.constant 0 : i32
    %c0_i32_0 = arith.constant 0 : i32
    %c0_i32_1 = arith.constant 0 : i32
    return %c0_i32, %c0_i32_0 : i32, i32
  }
  func.func @transform_5(%arg0: i32) -> (i32, i32) {
    %c0_i32 = arith.constant 0 : i32
    %c0_i32_0 = arith.constant 0 : i32
    %c0_i32_1 = arith.constant 0 : i32
    return %c0_i32, %c0_i32_0 : i32, i32
  }
  func.func @transform_6(%arg0: i32) -> (i32, i32) {
    %c0_i32 = arith.constant 0 : i32
    %c0_i32_0 = arith.constant 0 : i32
    %c0_i32_1 = arith.constant 0 : i32
    return %c0_i32, %c0_i32_0 : i32, i32
  }
  func.func @transform_7(%arg0: i32) -> (i32, i32) {
    %c0_i32 = arith.constant 0 : i32
    %c0_i32_0 = arith.constant 0 : i32
    %c0_i32_1 = arith.constant 0 : i32
    return %c0_i32, %c0_i32_0 : i32, i32
  }
  func.func @transform_8(%arg0: i32) -> (i32, i32) {
    %c0_i32 = arith.constant 0 : i32
    %c0_i32_0 = arith.constant 0 : i32
    %c0_i32_1 = arith.constant 0 : i32
    return %c0_i32, %c0_i32_0 : i32, i32
  }
  func.func @transform_9(%arg0: i32) -> (i32, i32) {
    %c0_i32 = arith.constant 0 : i32
    %c0_i32_0 = arith.constant 0 : i32
    return %c0_i32, %arg0 : i32, i32
  }
}

</mosaic_0001>

<bundles_post_ra>
// kernel: tile.9
= control target key start
LH: loop header
LB: loop body
LE: loop exit
PB: predicated region body
PF: predicated region fallthrough
CT: control target
= control target key end

     0   :  { %s131_s10 = smov 120   ;;  %s132_s11 = smov 104   ;;  %vm3_vm0 = vcmask 64512   ;;  %vm9_vm1 = vcmask 1048512   ;;  %vm15_vm2 = vcmask 982912   ;;  %vm21_vm3 = vcmask 917312   ;;  %s207_s0 = inlined_call_operand.vmem [shape: f32[16,8], index: 0, kind: input, shape index: {}]   ;;  %s208_s1 = inlined_call_operand.vmem [shape: f32[1,128], index: 1, kind: output, shape index: {}]  }
   0x1   :  { %v101_v0 = vld [vmem:[%s207_s0 + $0xf] sm:$0x1]   ;;  %v103_v1 = vld [vmem:[%s207_s0 + $0xd] sm:$0x1]   ;;  %v102_v2 = vld [vmem:[%s207_s0 + $0xe] sm:$0x1]  }
   0x2   :  { %7 = vrot.lane.b32.xlu0 %v101_v0, %s131_s10  ;;  %19 = vrot.lane.b32.xlu1 %v103_v1, %s132_s11  ;;  %v104_v3 = vld [vmem:[%s207_s0 + $0xc] sm:$0x1]   ;;  %s133_s16 = smov 112   ;;  %s134_s17 = smov 96   ;;  %v105_v4 = vld [vmem:[%s207_s0 + $0xb] sm:$0x1]  }
   0x3   :  { %v106_v5 = vld [vmem:[%s207_s0 + $0xa] sm:$0x1]   ;;  %v2_v6 = vld [vmem:[%s207_s0] sm:$0x1]   ;;  %s135_s24 = smov 88   ;;  %s136_s25 = smov 80  }
   0x4   :  { %4 = vst.msk [vmem:[#allocation0] sm:$0x1] %vm3_vm0, %v2_v6   ;;  %v107_v7 = vld [vmem:[%s207_s0 + $0x9] sm:$0x1]   ;;  %v108_v8 = vld [vmem:[%s207_s0 + $0x8] sm:$0x1]  }
   0x5   :  { %s137_s30 = smov 72   ;;  %s138_s2 = smov 64   ;;  %v109_v9 = vld [vmem:[%s207_s0 + $0x7] sm:$0x1]   ;;  %v110_v10 = vld [vmem:[%s207_s0 + $0x6] sm:$0x1]  }
   0x6   :  { %13 = vrot.lane.b32.xlu0 %v102_v2, %s133_s16  ;;  %25 = vrot.lane.b32.xlu1 %v104_v3, %s134_s17  ;;  %s139_s7 = smov 56   ;;  %s140_s8 = smov 48   ;;  %v111_v11 = vld [vmem:[%s207_s0 + $0x5] sm:$0x1]   ;;  %v112_v12 = vld [vmem:[%s207_s0 + $0x4] sm:$0x1]  }
   0x7   :  { %s141_s13 = smov 40   ;;  %s142_s14 = smov 32   ;;  %v113_v13 = vld [vmem:[%s207_s0 + $0x3] sm:$0x1]   ;;  %v114_v14 = vld [vmem:[%s207_s0 + $0x2] sm:$0x1]  }
   0x8   :  { %s143_s19 = smov 24   ;;  %s144_s20 = smov 16   ;;  %v115_v15 = vld [vmem:[%s207_s0 + $0x1] sm:$0x1]   ;;  %vm27_vm4 = vcmask 851712   ;;  %vm33_vm5 = vcmask 786112  }
   0x9   :  { %s145_s0 = smov 8   ;;  %vm39_vm6 = vcmask 720512   ;;  %vm45_vm7 = vcmask 654912   ;;  %vm51_vm8 = vcmask 589312   ;;  %vm57_vm9 = vcmask 523712  }
   0xa   :  { %31 = vrot.lane.b32.xlu0 %v105_v4, %s135_s24  ;;  %37 = vrot.lane.b32.xlu1 %v106_v5, %s136_s25  ;;  %vm63_vm10 = vcmask 458112   ;;  %vm69_vm11 = vcmask 392512   ;;  %vm75_vm12 = vcmask 326912   ;;  %vm81_vm13 = vcmask 261312  }
   0xb   :  { %vm87_vm14 = vcmask 195712   ;;  %vm93_vm15 = vcmask 130112  }
   0xe   :  { %43 = vrot.lane.b32.xlu0 %v107_v7, %s137_s30  ;;  %49 = vrot.lane.b32.xlu1 %v108_v8, %s138_s2 }
  0x12   :  { %55 = vrot.lane.b32.xlu0 %v109_v9, %s139_s7  ;;  %61 = vrot.lane.b32.xlu1 %v110_v10, %s140_s8 }
  0x16   :  { %67 = vrot.lane.b32.xlu0 %v111_v11, %s141_s13  ;;  %73 = vrot.lane.b32.xlu1 %v112_v12, %s142_s14 }
  0x1a   :  { %79 = vrot.lane.b32.xlu0 %v113_v13, %s143_s19  ;;  %85 = vrot.lane.b32.xlu1 %v114_v14, %s144_s20 }
  0x1e   :  { %91 = vrot.lane.b32.xlu0 %v115_v15, %s145_s0 }
  0x74   :  { %v8_v16 = vpop.permute.xlu0 %7   ;;  %v20_v17 = vpop.permute.xlu1 %19  }
  0x75   :  { %10 = vst.msk [vmem:[#allocation0] sm:$0x1] %vm9_vm1, %v8_v16  }
  0x78   :  { %v14_v18 = vpop.permute.xlu0 %13   ;;  %v26_v19 = vpop.permute.xlu1 %25  }
  0x79   :  { %16 = vst.msk [vmem:[#allocation0] sm:$0x1] %vm15_vm2, %v14_v18  }
  0x7a   :  { %22 = vst.msk [vmem:[#allocation0] sm:$0x1] %vm21_vm3, %v20_v17  }
  0x7b   :  { %28 = vst.msk [vmem:[#allocation0] sm:$0x1] %vm27_vm4, %v26_v19  }
  0x7c   :  { %v32_v20 = vpop.permute.xlu0 %31   ;;  %v38_v21 = vpop.permute.xlu1 %37  }
  0x7d   :  { %34 = vst.msk [vmem:[#allocation0] sm:$0x1] %vm33_vm5, %v32_v20  }
  0x7e   :  { %40 = vst.msk [vmem:[#allocation0] sm:$0x1] %vm39_vm6, %v38_v21  }
  0x80   :  { %v44_v22 = vpop.permute.xlu0 %43   ;;  %v50_v23 = vpop.permute.xlu1 %49  }
  0x81   :  { %46 = vst.msk [vmem:[#allocation0] sm:$0x1] %vm45_vm7, %v44_v22  }
  0x82   :  { %52 = vst.msk [vmem:[#allocation0] sm:$0x1] %vm51_vm8, %v50_v23  }
  0x84   :  { %v56_v24 = vpop.permute.xlu0 %55   ;;  %v62_v25 = vpop.permute.xlu1 %61  }
  0x85   :  { %58 = vst.msk [vmem:[#allocation0] sm:$0x1] %vm57_vm9, %v56_v24  }
  0x86   :  { %64 = vst.msk [vmem:[#allocation0] sm:$0x1] %vm63_vm10, %v62_v25  }
  0x88   :  { %v68_v26 = vpop.permute.xlu0 %67   ;;  %v74_v27 = vpop.permute.xlu1 %73  }
  0x89   :  { %70 = vst.msk [vmem:[#allocation0] sm:$0x1] %vm69_vm11, %v68_v26  }
  0x8a   :  { %76 = vst.msk [vmem:[#allocation0] sm:$0x1] %vm75_vm12, %v74_v27  }
  0x8c   :  { %v80_v28 = vpop.permute.xlu0 %79   ;;  %v86_v29 = vpop.permute.xlu1 %85  }
  0x8d   :  { %82 = vst.msk [vmem:[#allocation0] sm:$0x1] %vm81_vm13, %v80_v28  }
  0x8e   :  { %88 = vst.msk [vmem:[#allocation0] sm:$0x1] %vm87_vm14, %v86_v29  }
  0x90   :  { %v92_v30 = vpop.permute.xlu0 %91  }
  0x91   :  { %94 = vst.msk [vmem:[#allocation0] sm:$0x1] %vm93_vm15, %v92_v30  }
  0x98   :  { %v98_v31 = vld [vmem:[#allocation0] sm:$0x1] }
  0x99   :  { %100 = vst [vmem:[%s208_s1] sm:$0x1] %v98_v31 }

// kernel: decoder_forward.1
= control target key start
LH: loop header
LB: loop body
LE: loop exit
PB: predicated region body
PF: predicated region fallthrough
CT: control target
= control target key end

     0   :  { %v990_v0 = vmov 1   ;;  %v991_v7 = vmov 0   ;;  %v129_v54 = vlaneseq  ;;  %vm574_vm0 = vcmask 523264   ;;  %s1314_s1 = inlined_call_operand.vmem [shape: f32[128,2], index: 1, kind: input, shape index: {}]   ;;  %s1315_s2 = inlined_call_operand.vmem [shape: f32[128,1], index: 2, kind: input, shape index: {}]   ;;  %s1316_s4 = inlined_call_operand.vmem [shape: f32[64,1], index: 4, kind: input, shape index: {}]   ;;  %s1317_s6 = inlined_call_operand.vmem [shape: f32[32,1], index: 6, kind: input, shape index: {}]   ;;  %s1318_s8 = inlined_call_operand.vmem [shape: f32[2,1], index: 8, kind: input, shape index: {}]   ;;  %s1319_s3 = inlined_call_operand.vmem [shape: f32[64,128], index: 3, kind: input, shape index: {}]   ;;  %s1320_s0 = inlined_call_operand.vmem [shape: f32[2,128], index: 0, kind: input, shape index: {}]   ;;  %s1321_s5 = inlined_call_operand.vmem [shape: f32[32,64], index: 5, kind: input, shape index: {}]   ;;  %s1322_s7 = inlined_call_operand.vmem [shape: f32[2,32], index: 7, kind: input, shape index: {}]   ;;  %s1323_s9 = inlined_call_operand.vmem [shape: f32[2,128], index: 9, kind: output, shape index: {}]  }
   0x1   :  { %970 = vset.pattern.permute.xlu0 %v990_v0  ;;  %968 = vset.pattern.permute.xlu1 %v990_v0  ;;  %v35_v1 = vld [vmem:[%s1314_s1 + $0x10] sm:$0xff]  ;;  %v33_v2 = vld [vmem:[%s1314_s1] sm:$0xff]  ;;  %v34_v4 = vld [vmem:[%s1314_s1 + $0x8] sm:$0xff]  ;;  %vm993_vm1 = vmmov 0   ;;  %vm683_vm2 = vcmask 261120  }
   0x2   :  { %158 = vperm.xlu0 %970, %v35_v1   ;;  %150 = vperm.xlu1 %968, %v33_v2   ;;  %v37_v3 = vld [vmem:[%s1314_s1 + $0x20] sm:$0xff]  ;;  %v39_v5 = vld [vmem:[%s1314_s1 + $0x30] sm:$0xff]  ;;  %v36_v6 = vld [vmem:[%s1314_s1 + $0x18] sm:$0xff]  ;;  %v1213_v58 = vshrl.u32 %v129_v54, 7 }
   0x3   :  { %v41_v8 = vld [vmem:[%s1314_s1 + $0x40] sm:$0xff]  ;;  %v43_v9 = vld [vmem:[%s1314_s1 + $0x50] sm:$0xff]  ;;  %v38_v13 = vld [vmem:[%s1314_s1 + $0x28] sm:$0xff] }
   0x4   :  { %v249_v10 = vld [vmem:[%s1315_s2] sm:$0xff]  ;;  %v1086_v12 = vld [vmem:[%s1314_s1 + $0x70] sm:$0xff]  ;;  %v250_v15 = vld [vmem:[%s1315_s2 + $0x8] sm:$0xff]  ;;  %v215_v62 = vsub.s32 1, %v1213_v58  ;;  %v131_v63 = vsub.s32 0, %v1213_v58  ;;  %vm779_vm5 = vcmp.eq.s32.totalorder %v1213_v58, 0 }
   0x5   :  { %v1079_v11 = vld [vmem:[%s1314_s1 + $0x60] sm:$0xff]  ;;  %v251_v14 = vld [vmem:[%s1315_s2 + $0x10] sm:$0xff]  ;;  %v252_v16 = vld [vmem:[%s1315_s2 + $0x18] sm:$0xff] }
   0x6   :  { %166 = vperm.xlu0 %970, %v37_v3   ;;  %154 = vperm.xlu1 %968, %v34_v4   ;;  %v40_v17 = vld [vmem:[%s1314_s1 + $0x38] sm:$0xff]  ;;  %v254_v18 = vld [vmem:[%s1315_s2 + $0x28] sm:$0xff]  ;;  %v253_v20 = vld [vmem:[%s1315_s2 + $0x20] sm:$0xff] }
   0x7   :  { %v256_v19 = vld [vmem:[%s1315_s2 + $0x38] sm:$0xff]  ;;  %v258_v21 = vld [vmem:[%s1315_s2 + $0x48] sm:$0xff]  ;;  %v385_v25 = vld [vmem:[%s1316_s4] sm:$0xff] }
   0x8   :  { %v260_v22 = vld [vmem:[%s1315_s2 + $0x58] sm:$0xff]  ;;  %v42_v23 = vld [vmem:[%s1314_s1 + $0x48] sm:$0xff]  ;;  %v255_v26 = vld [vmem:[%s1315_s2 + $0x30] sm:$0xff] }
   0x9   :  { %v262_v24 = vld [vmem:[%s1315_s2 + $0x68] sm:$0xff]  ;;  %v387_v27 = vld [vmem:[%s1316_s4 + $0x10] sm:$0xff]  ;;  %v389_v28 = vld [vmem:[%s1316_s4 + $0x20] sm:$0xff] }
   0xa   :  { %174 = vperm.xlu0 %970, %v39_v5   ;;  %969 = vset.pattern.permute.xlu1 %v991_v7  ;;  %v44_v29 = vld [vmem:[%s1314_s1 + $0x58] sm:$0xff]  ;;  %v391_v30 = vld [vmem:[%s1316_s4 + $0x30] sm:$0xff]  ;;  %v550_v31 = vld [vmem:[%s1317_s6] sm:$0xff] }
   0xb   :  { %66 = vperm.xlu1 %969, %v36_v6   ;;  %v552_v32 = vld [vmem:[%s1317_s6 + $0x10] sm:$0xff]  ;;  %v257_v33 = vld [vmem:[%s1315_s2 + $0x40] sm:$0xff]  ;;  %v46_v35 = vld [vmem:[%s1314_s1 + $0x68] sm:$0xff] }
   0xc   :  { %v677_v34 = vld [vmem:[%s1318_s8] sm:$0x3]  ;;  %v259_v36 = vld [vmem:[%s1315_s2 + $0x50] sm:$0xff]  ;;  %v48_v37 = vld [vmem:[%s1314_s1 + $0x78] sm:$0xff] }
   0xd   :  { %v261_v38 = vld [vmem:[%s1315_s2 + $0x60] sm:$0xff]  ;;  %v263_v41 = vld [vmem:[%s1315_s2 + $0x70] sm:$0xff]  ;;  %v264_v44 = vld [vmem:[%s1315_s2 + $0x78] sm:$0xff] }
   0xe   :  { %182 = vperm.xlu0 %970, %v41_v8   ;;  %v386_v47 = vld [vmem:[%s1316_s4 + $0x8] sm:$0xff]  ;;  %v388_v49 = vld [vmem:[%s1316_s4 + $0x18] sm:$0xff]  ;;  %v377_v52 = vld [vmem:[%s1319_s3] sm:$0xff] }
   0xf   :  { %971 = vset.pattern.permute.xlu1 %v990_v0  ;;  %v390_v53 = vld [vmem:[%s1316_s4 + $0x28] sm:$0xff]  ;;  %864 = vmatprep.mubr.f32.mxu0 %v377_v52  ;;  %v392_v57 = vld [vmem:[%s1316_s4 + $0x38] sm:$0xff] }
  0x10   :  { %162 = vperm.xlu1 %971, %v36_v6   ;;  %v551_v61 = vld [vmem:[%s1317_s6 + $0x8] sm:$0xff] }
  0x12   :  { %190 = vperm.xlu0 %970, %v43_v9  }
  0x14   :  { %972 = vset.pattern.permute.xlu1 %v991_v7 }
  0x15   :  { %267 = vperm.xlu1 %972, %v249_v10  }
  0x16   :  { %198 = vperm.xlu0 %970, %v1079_v11  }
  0x19   :  { %71 = vperm.xlu1 %972, %v37_v3   ;;  %v553_v3 = vld [vmem:[%s1317_s6 + $0x18] sm:$0xff] }
  0x1a   :  { %206 = vperm.xlu0 %970, %v1086_v12  }
  0x1d   :  { %76 = vperm.xlu1 %972, %v38_v13  }
  0x1e   :  { %983 = vset.pattern.permute.xlu0 %v991_v7 }
  0x1f   :  { %51 = vperm.xlu0 %983, %v33_v2  }
  0x21   :  { %973 = vset.pattern.permute.xlu1 %v990_v0 }
  0x22   :  { %170 = vperm.xlu1 %973, %v38_v13  }
  0x23   :  { %56 = vperm.xlu0 %983, %v34_v4  }
  0x26   :  { %974 = vset.pattern.permute.xlu1 %v991_v7 }
  0x27   :  { %61 = vperm.xlu0 %983, %v35_v1   ;;  %277 = vperm.xlu1 %974, %v251_v14  }
  0x2b   :  { %272 = vperm.xlu0 %983, %v250_v15   ;;  %81 = vperm.xlu1 %974, %v39_v5  }
  0x2f   :  { %282 = vperm.xlu0 %983, %v252_v16   ;;  %86 = vperm.xlu1 %974, %v40_v17  }
  0x33   :  { %292 = vperm.xlu0 %983, %v254_v18   ;;  %975 = vset.pattern.permute.xlu1 %v990_v0 }
  0x34   :  { %178 = vperm.xlu1 %975, %v40_v17  }
  0x37   :  { %302 = vperm.xlu0 %983, %v256_v19  }
  0x38   :  { %976 = vset.pattern.permute.xlu1 %v991_v7 }
  0x39   :  { %287 = vperm.xlu1 %976, %v253_v20  }
  0x3b   :  { %312 = vperm.xlu0 %983, %v258_v21  }
  0x3d   :  { %91 = vperm.xlu1 %976, %v41_v8  }
  0x3f   :  { %322 = vperm.xlu0 %983, %v260_v22  }
  0x41   :  { %96 = vperm.xlu1 %976, %v42_v23  }
  0x43   :  { %332 = vperm.xlu0 %983, %v262_v24  }
  0x45   :  { %977 = vset.pattern.permute.xlu1 %v990_v0 }
  0x46   :  { %186 = vperm.xlu1 %977, %v42_v23  }
  0x47   :  { %395 = vperm.xlu0 %983, %v385_v25  }
  0x4a   :  { %978 = vset.pattern.permute.xlu1 %v991_v7 }
  0x4b   :  { %297 = vperm.xlu1 %978, %v255_v26   ;;  %405 = vperm.xlu0 %983, %v387_v27  }
  0x4f   :  { %101 = vperm.xlu1 %978, %v43_v9   ;;  %415 = vperm.xlu0 %983, %v389_v28  }
  0x53   :  { %106 = vperm.xlu1 %978, %v44_v29   ;;  %425 = vperm.xlu0 %983, %v391_v30  }
  0x57   :  { %979 = vset.pattern.permute.xlu1 %v990_v0  ;;  %556 = vperm.xlu0 %983, %v550_v31  }
  0x58   :  { %194 = vperm.xlu1 %979, %v44_v29  }
  0x5b   :  { %566 = vperm.xlu0 %983, %v552_v32  }
  0x5c   :  { %980 = vset.pattern.permute.xlu1 %v991_v7 }
  0x5d   :  { %307 = vperm.xlu1 %980, %v257_v33  }
  0x5f   :  { %680 = vperm.xlu0 %983, %v677_v34  }
  0x61   :  { %111 = vperm.xlu1 %980, %v1079_v11  }
  0x65   :  { %116 = vperm.xlu1 %980, %v46_v35  }
  0x69   :  { %981 = vset.pattern.permute.xlu1 %v990_v0 }
  0x6a   :  { %202 = vperm.xlu1 %981, %v46_v35  }
  0x6e   :  { %982 = vset.pattern.permute.xlu1 %v991_v7 }
  0x6f   :  { %317 = vperm.xlu1 %982, %v259_v36  }
  0x73   :  { %121 = vperm.xlu1 %982, %v1086_v12  }
  0x77   :  { %126 = vperm.xlu1 %982, %v48_v37  }
  0x7b   :  { %984 = vset.pattern.permute.xlu1 %v990_v0  ;;  %v32_v0 = vld [vmem:[%s1320_s0] sm:$0x3] }
  0x7c   :  { %210 = vperm.xlu1 %984, %v48_v37   ;;  %v1228_v4 = vrot.slane %v32_v0, %v215_v62  ;;  %v1230_v5 = vrot.slane %v32_v0, %v131_v63 }
  0x80   :  { %985 = vset.pattern.permute.xlu1 %v991_v7 }
  0x81   :  { %327 = vperm.xlu1 %985, %v261_v38   ;;  %v151_v39 = vpop.permute.xlu1 %150  ;;  %v159_v40 = vpop.permute.xlu0 %158 }
  0x82   :  { %v217_v9 = vmul.f32 %v1228_v4, %v151_v39  ;;  %v219_v10 = vmul.f32 %v1228_v4, %v159_v40 }
  0x85   :  { %337 = vperm.xlu1 %985, %v263_v41   ;;  %v155_v42 = vpop.permute.xlu1 %154  ;;  %v1185_v43 = vpop.permute.xlu0 %166 }
  0x86   :  { %v218_v15 = vmul.f32 %v1228_v4, %v155_v42  ;;  %v221_v36 = vmul.f32 %v1228_v4, %v1185_v43 }
  0x89   :  { %342 = vperm.xlu1 %985, %v264_v44   ;;  %v1190_v45 = vpop.permute.xlu0 %174 }
  0x8a   :  { %v67_v46 = vpop.permute.xlu1 %66 }
  0x8b   :  { %v136_v23 = vmul.f32 %v1230_v5, %v67_v46 }
  0x8d   :  { %400 = vperm.xlu1 %985, %v386_v47   ;;  %v1195_v48 = vpop.permute.xlu0 %182 }
  0x8f   :  { %v163_v50 = vpop.permute.xlu1 %162 }
  0x90   :  { %v220_v17 = vmul.f32 %v1228_v4, %v163_v50 }
  0x91   :  { %410 = vperm.xlu1 %985, %v388_v49   ;;  %v1200_v51 = vpop.permute.xlu0 %190 }
  0x92   :  { %v236_v27 = vadd.f32 %v220_v17, %v136_v23 }
  0x94   :  { %v268_v55 = vpop.permute.xlu1 %267 }
  0x95   :  { %420 = vperm.xlu1 %985, %v390_v53   ;;  %v1208_v56 = vpop.permute.xlu0 %198 }
  0x98   :  { %v72_v59 = vpop.permute.xlu1 %71 }
  0x99   :  { %430 = vperm.xlu1 %985, %v392_v57   ;;  %v1215_v60 = vpop.permute.xlu0 %206  ;;  %v137_v37 = vmul.f32 %v1230_v5, %v72_v59  ;;  %v223_v59 = vmul.f32 %v1228_v4, %v1190_v45 }
  0x9b   :  { %v237_v46 = vadd.f32 %v221_v36, %v137_v37 }
  0x9c   :  { %v77_v1 = vpop.permute.xlu1 %76 }
  0x9d   :  { %561 = vperm.xlu1 %985, %v551_v61   ;;  %v138_v38 = vmul.f32 %v1230_v5, %v77_v1 }
  0x9e   :  { %v52_v2 = vpop.permute.xlu0 %51 }
  0x9f   :  { %v133_v6 = vmul.f32 %v1230_v5, %v52_v2 }
  0xa1   :  { %571 = vperm.xlu1 %985, %v553_v3   ;;  %v171_v7 = vpop.permute.xlu1 %170  ;;  %v233_v11 = vadd.f32 %v217_v9, %v133_v6 }
  0xa2   :  { %v57_v8 = vpop.permute.xlu0 %56  ;;  %v222_v33 = vmul.f32 %v1228_v4, %v171_v7 }
  0xa3   :  { %v134_v12 = vmul.f32 %v1230_v5, %v57_v8  ;;  %v345_v20 = vadd.f32 %v268_v55, %v233_v11 }
  0xa4   :  { %v238_v42 = vadd.f32 %v222_v33, %v138_v38 }
  0xa5   :  { %v234_v19 = vadd.f32 %v218_v15, %v134_v12  ;;  %v361_v28 = vmax.f32 %v345_v20, 0.0 }
  0xa6   :  { %v62_v13 = vpop.permute.xlu0 %61  ;;  %v278_v14 = vpop.permute.xlu1 %277 }
  0xa7   :  { %v135_v16 = vmul.f32 %v1230_v5, %v62_v13  ;;  %v225_v13 = vmul.f32 %v1228_v4, %v1195_v48 }
  0xa9   :  { %v235_v18 = vadd.f32 %v219_v10, %v135_v16 }
  0xaa   :  { %v273_v21 = vpop.permute.xlu0 %272  ;;  %v82_v22 = vpop.permute.xlu1 %81 }
  0xab   :  { %v346_v24 = vadd.f32 %v273_v21, %v234_v19  ;;  %v347_v25 = vadd.f32 %v278_v14, %v235_v18  ;;  %v139_v61 = vmul.f32 %v1230_v5, %v82_v22 }
  0xad   :  { %v362_v26 = vmax.f32 %v346_v24, 0.0  ;;  %v363_v34 = vmax.f32 %v347_v25, 0.0  ;;  %v239_v2 = vadd.f32 %v223_v59, %v139_v61 }
  0xae   :  { %v283_v29 = vpop.permute.xlu0 %282  ;;  %v87_v30 = vpop.permute.xlu1 %86 }
  0xaf   :  { %v348_v31 = vadd.f32 %v283_v29, %v236_v27  ;;  %v909_v32 = vpack.c.bf16 %v362_v26, %v361_v28  ;;  %v140_v57 = vmul.f32 %v1230_v5, %v87_v30 }
  0xb1   :  { %v364_v35 = vmax.f32 %v348_v31, 0.0  ;;  %910 = vmatprep.subr.bf16.mxu0 %v909_v32  ;;  %v227_v31 = vmul.f32 %v1228_v4, %v1200_v51 }
  0xb2   :  { %912 = vmatpush3.bf16.msra.mxu0 %v909_v32  ;;  %v293_v41 = vpop.permute.xlu0 %292 }
  0xb3   :  { %v913_v39 = vpack.c.bf16 %v364_v35, %v363_v34  ;;  %v179_v40 = vpop.permute.xlu1 %178  ;;  %v350_v44 = vadd.f32 %v293_v41, %v238_v42 }
  0xb4   :  { %v224_v55 = vmul.f32 %v1228_v4, %v179_v40 }
  0xb5   :  { %914 = vmatprep.subr.bf16.mxu0 %v913_v39  ;;  %v366_v50 = vmax.f32 %v350_v44, 0.0 }
  0xb6   :  { %916 = vmatpush3.bf16.msra.mxu0 %v913_v39  ;;  %v240_v62 = vadd.f32 %v224_v55, %v140_v57  ;;  %v303_v0 = vpop.permute.xlu0 %302  ;;  %v231_v57 = vmul.f32 %v1228_v4, %v1215_v60  ;;  %v378_v60 = vld [vmem:[%s1319_s3 + $0x8] sm:$0xff] }
  0xb8   :  { %v288_v47 = vpop.permute.xlu1 %287  ;;  %v352_v1 = vadd.f32 %v303_v0, %v240_v62 }
  0xb9   :  { %v349_v49 = vadd.f32 %v288_v47, %v237_v46 }
  0xba   :  { %v368_v7 = vmax.f32 %v352_v1, 0.0  ;;  %v313_v17 = vpop.permute.xlu0 %312 }
  0xbb   :  { %v365_v52 = vmax.f32 %v349_v49, 0.0  ;;  %v229_v49 = vmul.f32 %v1228_v4, %v1208_v56 }
  0xbc   :  { %v92_v53 = vpop.permute.xlu1 %91 }
  0xbd   :  { %v917_v54 = vpack.c.bf16 %v366_v50, %v365_v52  ;;  %v141_v14 = vmul.f32 %v1230_v5, %v92_v53 }
  0xbe   :  { %v323_v32 = vpop.permute.xlu0 %322 }
  0xbf   :  { %918 = vmatprep.subr.bf16.mxu0 %v917_v54  ;;  %v241_v19 = vadd.f32 %v225_v13, %v141_v14  ;;  %v384_v13 = vld [vmem:[%s1319_s3 + $0x38] sm:$0xff]  ;;  %v546_v14 = vld [vmem:[%s1321_s5] sm:$0xff] }
  0xc0   :  { %v97_v43 = vpop.permute.xlu1 %96  ;;  %920 = vmatpush3.bf16.msra.mxu0 %v917_v54  ;;  %892 = vmatprep.mubr.msk.f32.mxu1 %vm574_vm0, %v546_v14 }
  0xc1   :  { %v142_v45 = vmul.f32 %v1230_v5, %v97_v43 }
  0xc2   :  { %v333_v50 = vpop.permute.xlu0 %332 }
  0xc5   :  { %v187_v63 = vpop.permute.xlu1 %186 }
  0xc6   :  { %v226_v12 = vmul.f32 %v1228_v4, %v187_v63 }
  0xc8   :  { %v242_v15 = vadd.f32 %v226_v12, %v142_v45  ;;  %v382_v12 = vld [vmem:[%s1319_s3 + $0x28] sm:$0xff]  ;;  %v383_v45 = vld [vmem:[%s1319_s3 + $0x30] sm:$0xff] }
  0xca   :  { %v298_v3 = vpop.permute.xlu1 %297  ;;  %v354_v18 = vadd.f32 %v313_v17, %v242_v15 }
  0xcb   :  { %v351_v6 = vadd.f32 %v298_v3, %v239_v2 }
  0xcc   :  { %v370_v23 = vmax.f32 %v354_v18, 0.0 }
  0xcd   :  { %v367_v8 = vmax.f32 %v351_v6, 0.0 }
  0xce   :  { %v102_v9 = vpop.permute.xlu1 %101 }
  0xcf   :  { %v921_v10 = vpack.c.bf16 %v368_v7, %v367_v8  ;;  %v143_v28 = vmul.f32 %v1230_v5, %v102_v9 }
  0xd1   :  { %922 = vmatprep.subr.bf16.mxu0 %v921_v10  ;;  %v243_v34 = vadd.f32 %v227_v31, %v143_v28 }
  0xd2   :  { %v107_v11 = vpop.permute.xlu1 %106  ;;  %924 = vmatpush3.bf16.msra.mxu0 %v921_v10 }
  0xd3   :  { %v144_v48 = vmul.f32 %v1230_v5, %v107_v11  ;;  %v381_v11 = vld [vmem:[%s1319_s3 + $0x20] sm:$0xff] }
  0xd7   :  { %v195_v16 = vpop.permute.xlu1 %194 }
  0xd8   :  { %v228_v27 = vmul.f32 %v1228_v4, %v195_v16  ;;  %v396_v16 = vpop.permute.xlu0 %395 }
  0xda   :  { %v244_v29 = vadd.f32 %v228_v27, %v144_v48 }
  0xdc   :  { %v308_v20 = vpop.permute.xlu1 %307  ;;  %v356_v33 = vadd.f32 %v323_v32, %v244_v29 }
  0xdd   :  { %v353_v21 = vadd.f32 %v308_v20, %v241_v19  ;;  %v406_v19 = vpop.permute.xlu0 %405 }
  0xde   :  { %v372_v38 = vmax.f32 %v356_v33, 0.0 }
  0xdf   :  { %v369_v22 = vmax.f32 %v353_v21, 0.0 }
  0xe0   :  { %v112_v24 = vpop.permute.xlu1 %111 }
  0xe1   :  { %v925_v25 = vpack.c.bf16 %v370_v23, %v369_v22  ;;  %v145_v46 = vmul.f32 %v1230_v5, %v112_v24 }
  0xe3   :  { %926 = vmatprep.subr.bf16.mxu0 %v925_v25  ;;  %v245_v53 = vadd.f32 %v229_v49, %v145_v46 }
  0xe4   :  { %v117_v26 = vpop.permute.xlu1 %116  ;;  %928 = vmatpush3.bf16.msra.mxu0 %v925_v25 }
  0xe5   :  { %v146_v44 = vmul.f32 %v1230_v5, %v117_v26 }
  0xe9   :  { %v203_v30 = vpop.permute.xlu1 %202 }
  0xea   :  { %v230_v42 = vmul.f32 %v1228_v4, %v203_v30  ;;  %v416_v30 = vpop.permute.xlu0 %415 }
  0xec   :  { %v246_v47 = vadd.f32 %v230_v42, %v146_v44 }
  0xee   :  { %v318_v35 = vpop.permute.xlu1 %317  ;;  %v358_v52 = vadd.f32 %v333_v50, %v246_v47  ;;  %v426_v42 = vpop.permute.xlu0 %425 }
  0xef   :  { %v355_v36 = vadd.f32 %v318_v35, %v243_v34 }
  0xf0   :  { %v374_v62 = vmax.f32 %v358_v52, 0.0 }
  0xf1   :  { %v371_v37 = vmax.f32 %v355_v36, 0.0 }
  0xf2   :  { %v122_v39 = vpop.permute.xlu1 %121 }
  0xf3   :  { %v929_v40 = vpack.c.bf16 %v372_v38, %v371_v37  ;;  %v147_v43 = vmul.f32 %v1230_v5, %v122_v39 }
  0xf5   :  { %930 = vmatprep.subr.bf16.mxu0 %v929_v40  ;;  %v247_v2 = vadd.f32 %v231_v57, %v147_v43  ;;  %v549_v43 = vld [vmem:[%s1321_s5 + $0x18] sm:$0xff]  ;;  %v994_v57 = vmov 0.0  }
  0xf6   :  { %v127_v41 = vpop.permute.xlu1 %126  ;;  %932 = vmatpush3.bf16.msra.mxu0 %v929_v40 }
  0xf7   :  { %v148_v0 = vmul.f32 %v1230_v5, %v127_v41  ;;  %v380_v5 = vld [vmem:[%s1319_s3 + $0x18] sm:$0xff] }
  0xfb   :  { %v211_v51 = vpop.permute.xlu1 %210 }
  0xfc   :  { %v232_v59 = vmul.f32 %v1228_v4, %v211_v51  ;;  %v379_v4 = vld [vmem:[%s1319_s3 + $0x10] sm:$0xff] }
  0xfe   :  { %v248_v3 = vadd.f32 %v232_v59, %v148_v0 }
 0x100   :  { %v328_v54 = vpop.permute.xlu1 %327 }
 0x101   :  { %v357_v55 = vadd.f32 %v328_v54, %v245_v53  ;;  %v547_v53 = vld [vmem:[%s1321_s5 + $0x8] sm:$0xff]  ;;  %v548_v54 = vld [vmem:[%s1321_s5 + $0x10] sm:$0xff] }
 0x103   :  { %v373_v61 = vmax.f32 %v357_v55, 0.0  ;;  %v992_v55 = vmov 0.0|0.0  }
 0x104   :  { %v338_v63 = vpop.permute.xlu1 %337 }
 0x105   :  { %v933_v1 = vpack.c.bf16 %v374_v62, %v373_v61  ;;  %v359_v56 = vadd.f32 %v338_v63, %v247_v2  ;;  %v557_v61 = vpop.permute.xlu0 %556 }
 0x107   :  { %934 = vmatprep.subr.bf16.mxu0 %v933_v1  ;;  %v375_v8 = vmax.f32 %v359_v56, 0.0 }
 0x108   :  { %v343_v6 = vpop.permute.xlu1 %342  ;;  %936 = vmatpush3.bf16.msra.mxu0 %v933_v1 }
 0x109   :  { %v360_v7 = vadd.f32 %v343_v6, %v248_v3 }
 0x10b   :  { %v376_v9 = vmax.f32 %v360_v7, 0.0  ;;  %v567_v7 = vpop.permute.xlu0 %566 }
 0x10c   :  { %v401_v15 = vpop.permute.xlu1 %400 }
 0x10d   :  { %v937_v10 = vpack.c.bf16 %v376_v9, %v375_v8 }
 0x10f   :  { %938 = vmatprep.subr.bf16.mxu0 %v937_v10 }
 0x110   :  { %940 = vmatpush3.bf16.msra.mxu0 %v937_v10  ;;  %v411_v17 = vpop.permute.xlu1 %410 }
 0x113   :  { %865 = vmatmul.mubr.f32.vlgmr.msra.gmra.mrb[0].mxu0 %v378_v60 }
 0x114   :  { %867 = vmatprep.mubr.f32.mxu0 %v379_v4  ;;  %v421_v48 = vpop.permute.xlu1 %420 }
 0x117   :  { %868 = vmatmul.mubr.f32.gmra.mrb[2].mxu0 %v380_v5 }
 0x118   :  { %870 = vmatprep.mubr.f32.mxu0 %v381_v11  ;;  %v431_v39 = vpop.permute.xlu1 %430 }
 0x11b   :  { %871 = vmatmul.mubr.f32.gmra.mrb[4].mxu0 %v382_v12  ;;  %v676_v12 = vld [vmem:[%s1322_s7] sm:$0x3] }
 0x11c   :  { %873 = vmatprep.mubr.f32.mxu0 %v383_v45  ;;  %v562_v59 = vpop.permute.xlu1 %561  ;;  %v681_v45 = vpop.permute.xlu0 %680 }
 0x11f   :  { %874 = vmatmul.mubr.f32.gmra.mrb[6].mxu0 %v384_v13 }
 0x120   :  { %v572_v56 = vpop.permute.xlu1 %571 }
 0x1e6   :  { %v866_v18 = vpop.f32.mrb[0].mxu0 }
 0x1e7   :  { %v505_v20 = vadd.f32 %v866_v18, %v401_v15  ;;  %v499_v21 = vpop.f32.mrb[1].mxu0 }
 0x1e8   :  { %v500_v22 = vadd.f32 %v499_v21, %v396_v16 }
 0x1e9   :  { %v539_v23 = vmax.f32 %v505_v20, 0.0 }
 0x1ea   :  { %v538_v24 = vmax.f32 %v500_v22, 0.0  ;;  %v869_v25 = vpop.f32.mrb[2].mxu0 }
 0x1eb   :  { %v515_v26 = vadd.f32 %v869_v25, %v411_v17  ;;  %v509_v27 = vpop.f32.mrb[3].mxu0 }
 0x1ec   :  { %v510_v28 = vadd.f32 %v509_v27, %v406_v19  ;;  %v941_v29 = vpack.c.bf16 %v539_v23, %v538_v24 }
 0x1ed   :  { %v541_v31 = vmax.f32 %v515_v26, 0.0 }
 0x1ee   :  { %v540_v32 = vmax.f32 %v510_v28, 0.0  ;;  %v872_v33 = vpop.f32.mrb[4].mxu0  ;;  %942 = vmatprep.subr.bf16.mxu1 %v941_v29 }
 0x1ef   :  { %v525_v34 = vadd.f32 %v872_v33, %v421_v48  ;;  %v519_v35 = vpop.f32.mrb[5].mxu0  ;;  %944 = vmatpush3.bf16.msra.mxu1 %v941_v29 }
 0x1f0   :  { %v945_v36 = vpack.c.bf16 %v541_v31, %v540_v32  ;;  %v520_v37 = vadd.f32 %v519_v35, %v416_v30 }
 0x1f1   :  { %v543_v38 = vmax.f32 %v525_v34, 0.0 }
 0x1f2   :  { %v542_v40 = vmax.f32 %v520_v37, 0.0  ;;  %v875_v41 = vpop.f32.mrb[6].mxu0  ;;  %946 = vmatprep.subr.bf16.mxu1 %v945_v36 }
 0x1f3   :  { %v535_v44 = vadd.f32 %v875_v41, %v431_v39  ;;  %v529_v46 = vpop.f32.mrb[7].mxu0  ;;  %948 = vmatpush3.bf16.msra.mxu1 %v945_v36 }
 0x1f4   :  { %v949_v47 = vpack.c.bf16 %v543_v38, %v542_v40  ;;  %v530_v51 = vadd.f32 %v529_v46, %v426_v42 }
 0x1f5   :  { %v545_v49 = vmax.f32 %v535_v44, 0.0 }
 0x1f6   :  { %v544_v50 = vmax.f32 %v530_v51, 0.0  ;;  %950 = vmatprep.subr.bf16.mxu1 %v949_v47 }
 0x1f7   :  { %952 = vmatpush3.bf16.msra.mxu1 %v949_v47 }
 0x1f8   :  { %v953_v52 = vpack.c.bf16 %v545_v49, %v544_v50 }
 0x1fa   :  { %954 = vmatprep.subr.bf16.mxu1 %v953_v52 }
 0x1fb   :  { %956 = vmatpush3.bf16.msra.mxu1 %v953_v52 }
 0x1fc   :  { %957 = vmatprep.subr.bf16.mxu1 %v992_v55 }
 0x1fe   :  { %893 = vmatmul.mubr.msk.f32.vlgmr.msra.gmra.mrb[0].mxu1 %vm574_vm0, %v547_v53 }
 0x1ff   :  { %895 = vmatprep.mubr.msk.f32.mxu1 %vm574_vm0, %v548_v54 }
 0x202   :  { %896 = vmatmul.mubr.msk.f32.gmra.mrb[2].mxu1 %vm574_vm0, %v549_v43 }
 0x203   :  { %906 = vmatprep.mubr.msk.f32.mxu1 %vm993_vm1, %v994_v57 }
 0x2d1   :  { %v894_v62 = vpop.f32.mrb[0].mxu1 }
 0x2d2   :  { %v659_v63 = vadd.f32 %v894_v62, %v562_v59  ;;  %v653_v0 = vpop.f32.mrb[1].mxu1 }
 0x2d3   :  { %v654_v1 = vadd.f32 %v653_v0, %v557_v61 }
 0x2d4   :  { %v673_v2 = vmax.f32 %v659_v63, 0.0 }
 0x2d5   :  { %v672_v3 = vmax.f32 %v654_v1, 0.0  ;;  %v897_v6 = vpop.f32.mrb[2].mxu1 }
 0x2d6   :  { %v669_v8 = vadd.f32 %v897_v6, %v572_v56  ;;  %v663_v9 = vpop.f32.mrb[3].mxu1 }
 0x2d7   :  { %v958_v10 = vpack.c.bf16 %v673_v2, %v672_v3  ;;  %v664_v60 = vadd.f32 %v663_v9, %v567_v7 }
 0x2d8   :  { %v675_v4 = vmax.f32 %v669_v8, 0.0 }
 0x2d9   :  { %v674_v5 = vmax.f32 %v664_v60, 0.0  ;;  %959 = vmatpush3.bf16.msra.mxu1 %v958_v10 }
 0x2da   :  { %960 = vmatprep.subr.bf16.mxu1 %v992_v55 }
 0x2db   :  { %v961_v11 = vpack.c.bf16 %v675_v4, %v674_v5 }
 0x2dd   :  { %962 = vmatpush3.bf16.msra.mxu1 %v961_v11 }
 0x2e0   :  { %907 = vmatmul.mubr.msk.f32.vlgmr.msra.gmra.mrb[4].mxu1 %vm683_vm2, %v676_v12 }
 0x3b3   :  { %v753_v13 = vpop.f32.mrb[4].mxu1 }
 0x3b4   :  { %v754_v14 = vadd.f32 %v753_v13, %v681_v45  ;;  %v908_v15 = vpop.f32.mrb[5].mxu1 }
 0x3b6   :  { %v760_v16 = vand.u32 2147483647, %v754_v14  ;;  %v757_v27 = vmax.f32 %v754_v14, 0.0  ;;  %vm758_vm4 = vcmp.ne.f32.partialorder %v754_v14, %v754_v14 }
 0x3b8   :  { %v761_v17 = vsub.f32 0.0, %v760_v16 }
 0x3ba   :  { %v762_v18 = vmul.f32 1.442695, %v761_v17 }
 0x3bc   :  { %986 = vpow2.f32 %v762_v18 }
 0x3c6   :  { %v987_v19 = vpop.eup %986 }
 0x3c7   :  { %v764_v20 = vadd.f32 1.0, %v987_v19  ;;  %v767_v21 = vmul.f32 -0.5, %v987_v19  ;;  %v770_v23 = vand.u32 2147483647, %v987_v19 }
 0x3c9   :  { %988 = vlog2.f32 %v764_v20  ;;  %v768_v22 = vadd.f32 1.0, %v767_v21  ;;  %vm771_vm3 = vcmp.lt.f32.partialorder %v770_v23, 0.0004427343 }
 0x3cb   :  { %v769_v26 = vmul.f32 %v987_v19, %v768_v22 }
 0x3d3   :  { %v989_v24 = vpop.eup %988 }
 0x3d4   :  { %v766_v25 = vmul.f32 0.6931472, %v989_v24 }
 0x3d6   :  { %v772_v48 = vsel %vm771_vm3, %v769_v26, %v766_v25 }
 0x3d7   :  { %v773_v28 = vadd.f32 %v772_v48, %v757_v27 }
 0x3d9   :  { %v774_v29 = vsel %vm758_vm4, %v754_v14, %v773_v28 }
 0x3da   :  { %v775_v30 = vmul.f32 0.9, %v774_v29 }
 0x3dc   :  { %v776_v31 = vadd.f32 0.1, %v775_v30 }
 0x3de   :  { %v780_v32 = vsel %vm779_vm5, %v754_v14, %v776_v31 }
 0x3df   :  { %781 = vst [vmem:[%s1323_s9] sm:$0x3] %v780_v32 }

</bundles_post_ra>
